<compile_context>
chip_gen: v7x
topology: tpu7x:2x2x1
jax: 0.10.0
libtpu: 0.0.40
codegen_flags: <defaults>
</compile_context>

<pallas_src>
import functools

import jax
import jax.numpy as jnp
from jax.experimental import pallas as pl
from jax.experimental.pallas import tpu as pltpu


def _to_2tuple(v):
    return (v, v) if isinstance(v, int) else tuple(v)


def _round_up(x, m):
    return (x + m - 1) // m * m


# ---------------------------------------------------------------------------
# Pallas kernel: one (TM, Np) output tile = (TM, K) @ (K, Np) + bias(1, Np).
# Weight/bias blocks are grid-invariant (resident in VMEM).
# ---------------------------------------------------------------------------
def _proj_kernel(x_ref, w_ref, b_ref, o_ref):
    acc = jnp.dot(x_ref[...], w_ref[...], preferred_element_type=jnp.float32)
    o_ref[...] = (acc + b_ref[...]).astype(o_ref.dtype)


def _proj_matmul(patches_2d, w_t, bias_2d, *, out_dtype):
    """(M, K) @ (K, Np) + (1, Np) -> (M, Np); tiled over M only."""
    M, K = patches_2d.shape
    Kw, Np = w_t.shape
    assert Kw == K and bias_2d.shape == (1, Np)

    # M tile: sublane-aligned, up to 512 rows/step (fewer grid steps, bigger
    # x/out DMAs). Ragged last block handled by Pallas boundary masking — no
    # jnp.pad / output slice on M.
    tm = min(512, _round_up(M, 8))
    grid_m = pl.cdiv(M, tm)

    x_isz = jnp.dtype(patches_2d.dtype).itemsize
    w_isz = jnp.dtype(w_t.dtype).itemsize
    b_isz = jnp.dtype(bias_2d.dtype).itemsize
    o_isz = jnp.dtype(out_dtype).itemsize

    # Real traffic: weight/bias fetched once, x/out streamed once.
    cost = pl.CostEstimate(
        flops=2 * M * Np * K,
        transcendentals=0,
        bytes_accessed=M * K * x_isz + K * Np * w_isz + Np * b_isz
        + M * Np * o_isz,
    )

    # Right-sized VMEM request: double-buffered x/out tiles + (weight, bias)
    # counted twice for safety, 1.5x slack + headroom.  Single-digit MiB for
    # ViT configs -> safe on v7x's 64 MiB as well as v5e/v6e's 128 MiB.
    footprint = (2 * tm * K * x_isz
                 + 2 * tm * Np * o_isz
                 + 2 * K * Np * w_isz
                 + 2 * Np * b_isz)
    vmem_limit = max(int(1.5 * footprint) + (2 << 20), 8 << 20)

    return pl.pallas_call(
        _proj_kernel,
        out_shape=jax.ShapeDtypeStruct((M, Np), out_dtype),
        grid=(grid_m,),
        in_specs=[
            pl.BlockSpec((tm, K), lambda i: (i, 0)),   # streamed over M
            pl.BlockSpec((K, Np), lambda i: (0, 0)),   # resident (fetched once)
            pl.BlockSpec((1, Np), lambda i: (0, 0)),   # resident (fetched once)
        ],
        out_specs=pl.BlockSpec((tm, Np), lambda i: (i, 0)),
        compiler_params=pltpu.CompilerParams(
            dimension_semantics=("parallel",),          # megacore-shard M on v7x
            vmem_limit_bytes=vmem_limit,
        ),
        cost_estimate=cost,
    )(patches_2d, w_t, bias_2d)


# ---------------------------------------------------------------------------
# Whole forward, jitted so im2col transpose + bf16 cast fuse into one pass.
# ---------------------------------------------------------------------------
@functools.partial(
    jax.jit,
    static_argnames=("patch_size", "grid_hw", "embed_dim", "compute_dtype"))
def _patch_embed_forward(x, w_t, bias_2d, *, patch_size, grid_hw, embed_dim,
                         compute_dtype):
    B, C, H, W = x.shape
    ph, pw = patch_size
    oh, ow = grid_hw
    # Non-overlapping patches (stride == patch): pure reshape/transpose, fused
    # with the bf16 cast by XLA.
    # TODO(synk): fuse patch extraction into the Pallas input DMA
    # (allow_input_fusion / memory_space=pl.ANY + per-row-tile make_async_copy)
    # to remove this extra HBM round trip for very large images.
    p = x[:, :, :oh * ph, :ow * pw].reshape(B, C, oh, ph, ow, pw)
    p = jnp.transpose(p, (0, 2, 4, 1, 3, 5))            # (B, oh, ow, C, ph, pw)
    patches_2d = p.reshape(B * oh * ow, C * ph * pw).astype(compute_dtype)

    out = _proj_matmul(patches_2d, w_t, bias_2d, out_dtype=x.dtype)  # (M, Np)

    n_pad = w_t.shape[1]
    if n_pad != embed_dim:                               # only for unaligned E
        out = out[:, :embed_dim]
    return out.reshape(B, oh * ow, embed_dim)


# ---------------------------------------------------------------------------
# Module port.
# ---------------------------------------------------------------------------
class PatchEmbedOrg:
    """JAX/Pallas port of PatchEmbed_org (Conv2d patch projection, stride=patch)."""

    def __init__(self, img_size=224, patch_size=16, in_chans=3, embed_dim=768,
                 *, key=None, param_dtype=jnp.float32,
                 compute_dtype=jnp.bfloat16):
        self.img_size = _to_2tuple(img_size)
        self.patch_size = _to_2tuple(patch_size)
        self.in_chans = in_chans
        self.embed_dim = embed_dim
        self.compute_dtype = compute_dtype

        H, W = self.img_size
        ph, pw = self.patch_size
        oh, ow = H // ph, W // pw
        self.patch_hw = (W // pw, H // ph)   # same (quirky) order as original
        self.grid_hw = (oh, ow)
        self.num_patches = oh * ow

        # Deterministic parameter init (synthetic weights; no checkpoint load).
        if key is None:
            key = jax.random.PRNGKey(0)
        kw_, kb_ = jax.random.split(key)
        fan_in = in_chans * ph * pw
        bound = 1.0 / (fan_in ** 0.5)
        # PyTorch Conv2d weight shape: (embed_dim, in_chans, ph, pw)
        self.weight = jax.random.uniform(
            kw_, (embed_dim, in_chans, ph, pw), param_dtype, -bound, bound)
        self.bias = jax.random.uniform(kb_, (embed_dim,), param_dtype,
                                       -bound, bound)

        # One-time weight prep: flatten/transpose to (K, E), pad E to a
        # 128-multiple (no-op for 768/1024), cast weight to bf16 for the MXU.
        n_pad = _round_up(embed_dim, 128)
        w_t = self.weight.reshape(embed_dim, fan_in).T          # (K, E)
        b2 = self.bias.reshape(1, embed_dim).astype(jnp.float32)
        if n_pad != embed_dim:
            w_t = jnp.pad(w_t, ((0, 0), (0, n_pad - embed_dim)))
            b2 = jnp.pad(b2, ((0, 0), (0, n_pad - embed_dim)))
        self.weight_t = w_t.astype(compute_dtype)               # (K, n_pad) bf16
        self.bias_2d = b2                                        # (1, n_pad) f32

    def __call__(self, x):
        return _patch_embed_forward(
            x, self.weight_t, self.bias_2d,
            patch_size=self.patch_size, grid_hw=self.grid_hw,
            embed_dim=self.embed_dim, compute_dtype=self.compute_dtype)


# ---------------------------------------------------------------------------
# Pure-JAX reference (conv2d NCHW, stride = patch) for correctness checking.
# ---------------------------------------------------------------------------
def _reference(module, x):
    y = jax.lax.conv_general_dilated(
        x, module.weight,
        window_strides=module.patch_size, padding="VALID",
        dimension_numbers=("NCHW", "OIHW", "NCHW"))
    y = y + module.bias[None, :, None, None]
    B, E, oh, ow = y.shape
    return jnp.transpose(y.reshape(B, E, oh * ow), (0, 2, 1))


if __name__ == "__main__":
    key = jax.random.PRNGKey(0)
    k_param, k_x = jax.random.split(key)

    # Small shapes consistent with the module's forward:
    # batch=2, channels=4, spatial=16x16, patch=8 (stride=patch) -> 2x2=4
    # patches, embed_dim=32.
    B, C, H, W = 2, 4, 16, 16
    module = PatchEmbedOrg(img_size=(H, W), patch_size=8, in_chans=C,
                           embed_dim=32, key=k_param)

    x = jax.random.normal(k_x, (B, C, H, W), jnp.float32)

    out = module(x)
    out = jax.block_until_ready(out)

    ref = _reference(module, x)
    assert out.shape == (B, module.num_patches, module.embed_dim), out.shape
    # bf16 MXU feed with f32 accumulation vs f32 conv reference.
    assert jnp.allclose(out, ref, atol=5e-2, rtol=5e-2), "mismatch vs reference"

    print("KERNEL_OK")
</pallas_src>

<mosaic_0001>
module attributes {stable_mosaic.version = 11 : i64} {
  func.func @_proj_kernel(%arg0: i32, %arg1: memref<8x256xbf16, #tpu.memory_space<vmem>>, %arg2: memref<256x128xbf16, #tpu.memory_space<vmem>>, %arg3: memref<1x128xf32, #tpu.memory_space<vmem>>, %arg4: memref<8x128xf32, #tpu.memory_space<vmem>>) attributes {dimension_semantics = [#tpu.dimension_semantics<parallel>], iteration_bounds = array<i64: 1>, scalar_prefetch = 0 : i64, scratch_operands = 0 : i64, tpu.core_type = #tpu.core_type<tc>, window_params = [{transform_indices = @transform_0, window_bounds = array<i64: 8, 256>}, {pipeline_mode = #tpu.pipeline_mode<synchronous>, transform_indices = @transform_1, window_bounds = array<i64: 256, 128>}, {pipeline_mode = #tpu.pipeline_mode<synchronous>, transform_indices = @transform_2, window_bounds = array<i64: 1, 128>}, {transform_indices = @transform_3, window_bounds = array<i64: 8, 128>}]} {
    %c0 = arith.constant 0 : index
    %c0_0 = arith.constant 0 : index
    %0 = vector.load %arg1[%c0, %c0_0] : memref<8x256xbf16, #tpu.memory_space<vmem>>, vector<8x256xbf16>
    %c0_1 = arith.constant 0 : index
    %c0_2 = arith.constant 0 : index
    %1 = vector.load %arg2[%c0_1, %c0_2] : memref<256x128xbf16, #tpu.memory_space<vmem>>, vector<256x128xbf16>
    %cst = arith.constant dense<0.000000e+00> : vector<8x128xf32>
    %2 = tpu.matmul %0, %1, %cst {dimension_numbers = #tpu.dot_dimension_numbers<[1], [0], [0], [1], [0, 0, 1, 1], [], []>} : vector<8x256xbf16>, vector<256x128xbf16>, vector<8x128xf32> -> vector<8x128xf32>
    %c0_3 = arith.constant 0 : index
    %c0_4 = arith.constant 0 : index
    %3 = vector.load %arg3[%c0_3, %c0_4] : memref<1x128xf32, #tpu.memory_space<vmem>>, vector<1x128xf32>
    %4 = vector.broadcast %3 : vector<1x128xf32> to vector<8x128xf32>
    %5 = arith.addf %2, %4 : vector<8x128xf32>
    %c0_5 = arith.constant 0 : index
    %c0_6 = arith.constant 0 : index
    %6 = vector.load %arg4[%c0_5, %c0_6] : memref<8x128xf32, #tpu.memory_space<vmem>>, vector<8x128xf32>
    tpu.vector_store %arg4[%c0_5, %c0_6], %5 {strides = array<i32>} : memref<8x128xf32, #tpu.memory_space<vmem>>, vector<8x128xf32>,
    return
  }
  func.func @transform_0(%arg0: i32) -> (i32, i32) {
    %c0_i32 = arith.constant 0 : i32
    %c0_i32_0 = arith.constant 0 : i32
    return %arg0, %c0_i32 : i32, i32
  }
  func.func @transform_1(%arg0: i32) -> (i32, i32) {
    %c0_i32 = arith.constant 0 : i32
    %c0_i32_0 = arith.constant 0 : i32
    %c0_i32_1 = arith.constant 0 : i32
    return %c0_i32, %c0_i32_0 : i32, i32
  }
  func.func @transform_2(%arg0: i32) -> (i32, i32) {
    %c0_i32 = arith.constant 0 : i32
    %c0_i32_0 = arith.constant 0 : i32
    %c0_i32_1 = arith.constant 0 : i32
    return %c0_i32, %c0_i32_0 : i32, i32
  }
  func.func @transform_3(%arg0: i32) -> (i32, i32) {
    %c0_i32 = arith.constant 0 : i32
    %c0_i32_0 = arith.constant 0 : i32
    return %arg0, %c0_i32 : i32, i32
  }
}

</mosaic_0001>

<bundles_post_ra>
// kernel: _patch_embed_forward.1
= control target key start
LH: loop header
LB: loop body
LE: loop exit
PB: predicated region body
PF: predicated region fallthrough
CT: control target
= control target key end

     0   :  { %s385_s0 = inlined_call_operand.vmem [shape: bf16[8,256], index: 0, kind: input, shape index: {}]   ;;  %s386_s1 = inlined_call_operand.vmem [shape: bf16[256,128], index: 1, kind: input, shape index: {}]   ;;  %s387_s2 = inlined_call_operand.vmem [shape: f32[1,128], index: 2, kind: input, shape index: {}]   ;;  %s388_s3 = inlined_call_operand.hbm [shape: f32[8,128], index: 3, kind: output, shape index: {}]  }
   0x1   :  { %v256_v0 = vld [vmem:[%s386_s1 + $0x40] sm:$0xff]   ;;  %v258_v2 = vld [vmem:[%s386_s1 + $0x48] sm:$0xff]   ;;  %v260_v4 = vld [vmem:[%s386_s1 + $0x50] sm:$0xff]  }
   0x2   :  { %v257_v1 = vld [vmem:[%s386_s1] sm:$0xff]   ;;  %233 = vmatprep.subr.bf16.mxu0 %v256_v0  ;;  %v259_v3 = vld [vmem:[%s386_s1 + $0x8] sm:$0xff]   ;;  %v261_v5 = vld [vmem:[%s386_s1 + $0x10] sm:$0xff]  }
   0x3   :  { %234 = vmatpush3.bf16.msra.mxu0 %v257_v1  ;;  %v262_v6 = vld [vmem:[%s386_s1 + $0x58] sm:$0xff]   ;;  %v264_v8 = vld [vmem:[%s386_s1 + $0x60] sm:$0xff]   ;;  %v266_v10 = vld [vmem:[%s386_s1 + $0x68] sm:$0xff]  }
   0x4   :  { %235 = vmatprep.subr.bf16.mxu0 %v258_v2  ;;  %v263_v7 = vld [vmem:[%s386_s1 + $0x18] sm:$0xff]   ;;  %v265_v9 = vld [vmem:[%s386_s1 + $0x20] sm:$0xff]  }
   0x5   :  { %v16_v11 = vld [vmem:[%s385_s0] sm:$0xff] }
   0x7   :  { %236 = vmatpush3.bf16.msra.mxu0 %v259_v3 }
   0x8   :  { %237 = vmatprep.subr.bf16.mxu0 %v260_v4 }
   0xb   :  { %238 = vmatpush3.bf16.msra.mxu0 %v261_v5 }
   0xc   :  { %239 = vmatprep.subr.bf16.mxu0 %v262_v6 }
   0xf   :  { %240 = vmatpush3.bf16.msra.mxu0 %v263_v7 }
  0x10   :  { %241 = vmatprep.subr.bf16.mxu0 %v264_v8 }
  0x11   :  { %8 = vsyncpa [#allocation3], 0  ;;  %v216_v12 = vcombine.high %v16_v11, %v16_v11  ;;  %v267_v13 = vld [vmem:[%s386_s1 + $0x28] sm:$0xff]   ;;  %v268_v14 = vld [vmem:[%s386_s1 + $0x70] sm:$0xff]   ;;  %v215_v18 = vcombine.low %v16_v11, %v16_v11  ;;  %s298_s20 = smov [#allocation2]  }
  0x12   :  { %v269_v15 = vld [vmem:[%s386_s1 + $0x30] sm:$0xff]   ;;  %v270_v16 = vld [vmem:[%s386_s1 + $0x78] sm:$0xff]   ;;  %v214_v21 = vld [vmem:[%s387_s2] ss:$0 sm:$0xff]  ;;  %s206_s21 = sshll.u32 %s298_s20, 4  ;;  %s207_s21 = int_to_ptr.vmem [resolvable:$true] %s206_s21 }
  0x13   :  { %242 = vmatpush3.bf16.msra.mxu0 %v265_v9  ;;  %191 = vmatprep.mubr.bf16.mxu0 %v216_v12  ;;  %v271_v17 = vld [vmem:[%s386_s1 + $0x38] sm:$0xff]   ;;  %s274_s22 = scalar_lea.vmem %s207_s21, 128  ;;  %p279_p1 = scmp.lt.s32.totalorder %s207_s21, %s207_s21 }
  0x14   :  { %243 = vmatprep.subr.bf16.mxu0 %v266_v10  ;;  %p275_p0 = scmp.ne.s32.totalorder %s207_s21, %s274_s22  ;;  %p280_p2 = scmp.lt.s32.totalorder %s274_s22, %s274_s22 }
  0x16   :  { %p281_p3 = por %p280_p2, %p279_p1 }
  0x17   :  { %244 = vmatpush3.bf16.msra.mxu0 %v267_v13 }
  0x18   :  { %245 = vmatprep.subr.bf16.mxu0 %v268_v14  ;;  %p282_p4 = pnand %p281_p3, %p275_p0 }
  0x1b   :  { %246 = vmatpush3.bf16.msra.mxu0 %v269_v15 }
  0x1c   :  { %247 = vmatprep.subr.bf16.mxu0 %v270_v16 }
  0x1f   :  { %248 = vmatpush3.bf16.msra.mxu0 %v271_v17 }
  0x22   :  { %192 = vmatmul.mubr.bf16.vlgmr.msra.gmra.mrb[0].mxu0 %v215_v18 }
  0xf5   :  { %v249_v19 = vpop.f32.mrb[0].mxu0 }
  0xf6   :  { %v250_v20 = vpop.f32.mrb[1].mxu0 }
  0xf7   :  { %v251_v22 = vadd.f32 %v250_v20, %v249_v19  ;;  %v252_v23 = vpop.f32.mrb[2].mxu0 }
  0xf8   :  { %v253_v24 = vpop.f32.mrb[3].mxu0 }
  0xf9   :  { %v194_v25 = vadd.f32 %v251_v22, %v214_v21 }
  0xfb   :  { %199 = vst [vmem:[#allocation2] sm:$0xff] %v194_v25 }
  0xfc   :  { %285 = shalt.err (!%p282_p4)
}
  0xfd   :  { %s286_s24 = scalar_lea.hbm %s388_s3, 128 }
  0xfe   :  { %p287_p5 = scmp.ne.s32.totalorder %s388_s3, %s286_s24  ;;  %p290_p6 = scmp.lt.u32.totalorder %s286_s24, %s388_s3 }
 0x100   :  { %p292_p7 = pnand %p290_p6, %p287_p5 }
 0x102   :  { %295 = shalt.err (!%p292_p7)
}
 0x103   :  { %209 = dma.vmem_to_hbm [thread:$0]  %s207_s21, 128, %s388_s3, [#allocation3]  }
 0x104   :  { %296 = dma.done.wait [#allocation3], 128  }
 0x105   :  { %297 = vsyncadd [#allocation3], 4294967168 }
 0x106   :  { %213 = vsyncpa [#allocation3], 1 }

</bundles_post_ra>
